<compile_context>
chip_gen: v7x
topology: tpu7x:2x2x1
jax: 0.10.0
libtpu: 0.0.40
codegen_flags: <defaults>
</compile_context>

<pallas_src>
import jax
import jax.numpy as jnp
from jax.experimental import pallas as pl
from jax.experimental.pallas import tpu as pltpu

IN_DIM = 256
HIDDEN_DIM = 128
OUT_DIM = 4
DROP_OUT = 0.2          # unused at inference (identity)
MAX_TILE_B = 1024       # 1024*256*4B (f32 x) = 1 MiB per buffer; tiny vs VMEM
SPLIT_THRESHOLD = 256   # force >=2 tiles above this so v7x megacore gets work


def _round_up(x, m):
    return ((x + m - 1) // m) * m


def _cdiv(a, b):
    return -(-a // b)


def _mlp_kernel(x_ref, w1_ref, b1_ref, w2_ref, b2_ref, o_ref):
    # Cast x f32 -> bf16 inside the kernel (hidden under the x DMA / MXU).
    x = x_ref[...].astype(jnp.bfloat16)
    # First linear: (tile_b, 256) bf16 @ (256, 128) bf16 -> f32 accumulator.
    h = jnp.dot(x, w1_ref[...], preferred_element_type=jnp.float32)
    # Bias + ReLU in f32 on the VPU.
    h = jnp.maximum(h + b1_ref[...], 0.0)
    # Dropout(p) in eval mode == identity.
    # Second linear: (tile_b, 128) bf16 @ (128, 4) bf16 -> f32.
    out = jnp.dot(h.astype(jnp.bfloat16), w2_ref[...],
                  preferred_element_type=jnp.float32)
    o_ref[...] = out + b2_ref[...]


def prepare_params(w1, b1, w2, b2):
    """One-time weight preparation (do NOT call per forward step).

    w1: (256, 128), b1: (1, 128), w2: (128, 4), b2: (1, 4), all f32,
    stored as (in, out) so the kernel computes x @ W.
    Returns (w1_bf16, b1_f32, w2_bf16, b2_f32).
    """
    return (w1.astype(jnp.bfloat16), b1, w2.astype(jnp.bfloat16), b2)


def _net_forward(x, w1b, b1, w2b, b2):
    """Forward pass of Net. x: (B, 256) f32 -> (B, 4) f32."""
    B = x.shape[0]

    # Tile choice (static, shape-derived): minimal padding, >=2 tiles for
    # mid/large B (v7x megacore), tiles multiple of 16 rows.
    n_tiles = _cdiv(B, MAX_TILE_B)
    if B >= SPLIT_THRESHOLD:
        n_tiles = max(n_tiles, 2)
    tile_b = _round_up(_cdiv(B, n_tiles), 16)
    b_padded = _cdiv(B, tile_b) * tile_b
    num_tiles = b_padded // tile_b

    if b_padded != B:
        x = jnp.pad(x, ((0, b_padded - B), (0, 0)))

    out = pl.pallas_call(
        _mlp_kernel,
        out_shape=jax.ShapeDtypeStruct((b_padded, OUT_DIM), jnp.float32),
        grid_spec=pltpu.PrefetchScalarGridSpec(
            num_scalar_prefetch=0,
            grid=(num_tiles,),
            in_specs=[
                # x: streamed per batch tile (auto double-buffered / pipelined).
                pl.BlockSpec((tile_b, IN_DIM), lambda i: (i, 0)),
                # Weights/biases: same block every step -> resident in VMEM.
                pl.BlockSpec((IN_DIM, HIDDEN_DIM), lambda i: (0, 0)),
                pl.BlockSpec((1, HIDDEN_DIM), lambda i: (0, 0)),
                pl.BlockSpec((HIDDEN_DIM, OUT_DIM), lambda i: (0, 0)),
                pl.BlockSpec((1, OUT_DIM), lambda i: (0, 0)),
            ],
            # Last block dim == full array dim (4), so this is legal and the
            # per-tile writeback is one contiguous (tile_b * 16 B) chunk.
            out_specs=pl.BlockSpec((tile_b, OUT_DIM), lambda i: (i, 0)),
        ),
        compiler_params=pltpu.CompilerParams(
            dimension_semantics=("parallel",),
        ),
    )(x, w1b, b1, w2b, b2)

    return out[:B]


# jit so the pad / tail-slice fuse around the pallas_call and host dispatch
# collapses to a single launch per forward step.
net_forward = jax.jit(_net_forward)


def init_params(key):
    """Deterministic init mimicking nn.Linear's uniform(-1/sqrt(fan_in), +)."""
    k1, k2, k3, k4 = jax.random.split(key, 4)
    bound1 = 1.0 / (IN_DIM ** 0.5)
    bound2 = 1.0 / (HIDDEN_DIM ** 0.5)
    # Stored as (in, out) so the kernel computes x @ W (PyTorch stores (out, in)).
    w1 = jax.random.uniform(k1, (IN_DIM, HIDDEN_DIM), jnp.float32, -bound1, bound1)
    b1 = jax.random.uniform(k2, (1, HIDDEN_DIM), jnp.float32, -bound1, bound1)
    w2 = jax.random.uniform(k3, (HIDDEN_DIM, OUT_DIM), jnp.float32, -bound2, bound2)
    b2 = jax.random.uniform(k4, (1, OUT_DIM), jnp.float32, -bound2, bound2)
    return w1, b1, w2, b2


if __name__ == "__main__":
    key = jax.random.PRNGKey(0)
    k_params, k_x = jax.random.split(key)
    w1, b1, w2, b2 = init_params(k_params)
    w1b, b1p, w2b, b2p = prepare_params(w1, b1, w2, b2)

    B = 8  # small DQN-style batch (exercises the clamped single-tile path)
    x = jax.random.normal(k_x, (B, IN_DIM), jnp.float32)

    out = net_forward(x, w1b, b1p, w2b, b2p)
    out = jax.block_until_ready(out)

    # Reference in plain JAX using the same bf16-input / f32-accumulate recipe.
    h_ref = jnp.maximum(
        jnp.dot(x.astype(jnp.bfloat16), w1b,
                preferred_element_type=jnp.float32) + b1p, 0.0)
    ref = jnp.dot(h_ref.astype(jnp.bfloat16), w2b,
                  preferred_element_type=jnp.float32) + b2p

    assert out.shape == (B, OUT_DIM)
    assert jnp.allclose(out, ref, atol=1e-2, rtol=1e-2)

    print("KERNEL_OK")
</pallas_src>

<mosaic_0001>
module attributes {stable_mosaic.version = 11 : i64} {
  func.func @_mlp_kernel(%arg0: i32, %arg1: memref<16x256xf32, #tpu.memory_space<vmem>>, %arg2: memref<256x128xbf16, #tpu.memory_space<vmem>>, %arg3: memref<1x128xf32, #tpu.memory_space<vmem>>, %arg4: memref<128x4xbf16, #tpu.memory_space<vmem>>, %arg5: memref<1x4xf32, #tpu.memory_space<vmem>>, %arg6: memref<16x4xf32, #tpu.memory_space<vmem>>) attributes {dimension_semantics = [#tpu.dimension_semantics<parallel>], iteration_bounds = array<i64: 1>, scalar_prefetch = 0 : i64, scratch_operands = 0 : i64, tpu.core_type = #tpu.core_type<tc>, window_params = [{transform_indices = @transform_0, window_bounds = array<i64: 16, 256>}, {pipeline_mode = #tpu.pipeline_mode<synchronous>, transform_indices = @transform_1, window_bounds = array<i64: 256, 128>}, {pipeline_mode = #tpu.pipeline_mode<synchronous>, transform_indices = @transform_2, window_bounds = array<i64: 1, 128>}, {pipeline_mode = #tpu.pipeline_mode<synchronous>, transform_indices = @transform_3, window_bounds = array<i64: 128, 4>}, {pipeline_mode = #tpu.pipeline_mode<synchronous>, transform_indices = @transform_4, window_bounds = array<i64: 1, 4>}, {transform_indices = @transform_5, window_bounds = array<i64: 16, 4>}]} {
    %c0 = arith.constant 0 : index
    %c0_0 = arith.constant 0 : index
    %0 = vector.load %arg1[%c0, %c0_0] : memref<16x256xf32, #tpu.memory_space<vmem>>, vector<16x256xf32>
    %1 = arith.truncf %0 : vector<16x256xf32> to vector<16x256xbf16>
    %c0_1 = arith.constant 0 : index
    %c0_2 = arith.constant 0 : index
    %2 = vector.load %arg2[%c0_1, %c0_2] : memref<256x128xbf16, #tpu.memory_space<vmem>>, vector<256x128xbf16>
    %cst = arith.constant dense<0.000000e+00> : vector<16x128xf32>
    %3 = tpu.matmul %1, %2, %cst {dimension_numbers = #tpu.dot_dimension_numbers<[1], [0], [0], [1], [0, 0, 1, 1], [], []>} : vector<16x256xbf16>, vector<256x128xbf16>, vector<16x128xf32> -> vector<16x128xf32>
    %c0_3 = arith.constant 0 : index
    %c0_4 = arith.constant 0 : index
    %4 = vector.load %arg3[%c0_3, %c0_4] : memref<1x128xf32, #tpu.memory_space<vmem>>, vector<1x128xf32>
    %5 = vector.broadcast %4 : vector<1x128xf32> to vector<16x128xf32>
    %6 = arith.addf %3, %5 : vector<16x128xf32>
    %cst_5 = arith.constant 0.000000e+00 : f32
    %7 = vector.broadcast %cst_5 : f32 to vector<16x128xf32>
    %8 = arith.maximumf %6, %7 : vector<16x128xf32>
    %9 = arith.truncf %8 : vector<16x128xf32> to vector<16x128xbf16>
    %c0_6 = arith.constant 0 : index
    %c0_7 = arith.constant 0 : index
    %10 = vector.load %arg4[%c0_6, %c0_7] : memref<128x4xbf16, #tpu.memory_space<vmem>>, vector<128x4xbf16>
    %cst_8 = arith.constant dense<0.000000e+00> : vector<16x4xf32>
    %11 = tpu.matmul %9, %10, %cst_8 {dimension_numbers = #tpu.dot_dimension_numbers<[1], [0], [0], [1], [0, 0, 1, 1], [], []>} : vector<16x128xbf16>, vector<128x4xbf16>, vector<16x4xf32> -> vector<16x4xf32>
    %c0_9 = arith.constant 0 : index
    %c0_10 = arith.constant 0 : index
    %12 = vector.load %arg5[%c0_9, %c0_10] : memref<1x4xf32, #tpu.memory_space<vmem>>, vector<1x4xf32>
    %13 = vector.broadcast %12 : vector<1x4xf32> to vector<16x4xf32>
    %14 = arith.addf %11, %13 : vector<16x4xf32>
    %c0_11 = arith.constant 0 : index
    %c0_12 = arith.constant 0 : index
    %15 = vector.load %arg6[%c0_11, %c0_12] : memref<16x4xf32, #tpu.memory_space<vmem>>, vector<16x4xf32>
    tpu.vector_store %arg6[%c0_11, %c0_12], %14 {strides = array<i32>} : memref<16x4xf32, #tpu.memory_space<vmem>>, vector<16x4xf32>,
    return
  }
  func.func @transform_0(%arg0: i32) -> (i32, i32) {
    %c0_i32 = arith.constant 0 : i32
    %c0_i32_0 = arith.constant 0 : i32
    return %arg0, %c0_i32 : i32, i32
  }
  func.func @transform_1(%arg0: i32) -> (i32, i32) {
    %c0_i32 = arith.constant 0 : i32
    %c0_i32_0 = arith.constant 0 : i32
    %c0_i32_1 = arith.constant 0 : i32
    return %c0_i32, %c0_i32_0 : i32, i32
  }
  func.func @transform_2(%arg0: i32) -> (i32, i32) {
    %c0_i32 = arith.constant 0 : i32
    %c0_i32_0 = arith.constant 0 : i32
    %c0_i32_1 = arith.constant 0 : i32
    return %c0_i32, %c0_i32_0 : i32, i32
  }
  func.func @transform_3(%arg0: i32) -> (i32, i32) {
    %c0_i32 = arith.constant 0 : i32
    %c0_i32_0 = arith.constant 0 : i32
    %c0_i32_1 = arith.constant 0 : i32
    return %c0_i32, %c0_i32_0 : i32, i32
  }
  func.func @transform_4(%arg0: i32) -> (i32, i32) {
    %c0_i32 = arith.constant 0 : i32
    %c0_i32_0 = arith.constant 0 : i32
    %c0_i32_1 = arith.constant 0 : i32
    return %c0_i32, %c0_i32_0 : i32, i32
  }
  func.func @transform_5(%arg0: i32) -> (i32, i32) {
    %c0_i32 = arith.constant 0 : i32
    %c0_i32_0 = arith.constant 0 : i32
    return %arg0, %c0_i32 : i32, i32
  }
}

</mosaic_0001>

<bundles_post_ra>
// kernel: _net_forward.1
= control target key start
LH: loop header
LB: loop body
LE: loop exit
PB: predicated region body
PF: predicated region fallthrough
CT: control target
= control target key end

     0   :  { %10 = vsyncpa [#allocation3], 0  ;;  %s470_s18 = smov [#allocation2]   ;;  %s574_s0 = inlined_call_operand.vmem [shape: f32[16,256], index: 0, kind: input, shape index: {}]   ;;  %s575_s1 = inlined_call_operand.hbm [shape: bf16[256,128], index: 1, kind: input, shape index: {}]   ;;  %s576_s2 = inlined_call_operand.vmem [shape: f32[1,128], index: 2, kind: input, shape index: {}]   ;;  %s577_s3 = inlined_call_operand.vmem [shape: bf16[128,4], index: 3, kind: input, shape index: {}]   ;;  %s578_s4 = inlined_call_operand.vmem [shape: f32[1,4], index: 4, kind: input, shape index: {}]   ;;  %s579_s5 = inlined_call_operand.vmem [shape: f32[16,4], index: 5, kind: output, shape index: {}]  }
   0x1   :  { %s18_s19 = sshll.u32 %s470_s18, 4  ;;  %s446_s22 = scalar_lea.hbm %s575_s1, 2048  ;;  %s19_s19 = int_to_ptr.vmem [resolvable:$true] %s18_s19 }
   0x2   :  { %p447_p0 = scmp.ne.s32.totalorder %s575_s1, %s446_s22  ;;  %p450_p1 = scmp.lt.u32.totalorder %s446_s22, %s575_s1 }
   0x4   :  { %p452_p2 = pnand %p450_p1, %p447_p0 }
   0x6   :  { %455 = shalt.err (!%p452_p2)
}
   0x7   :  { %s456_s27 = scalar_lea.vmem %s19_s19, 2048  ;;  %p461_p4 = scmp.lt.s32.totalorder %s19_s19, %s19_s19 }
   0x8   :  { %p457_p3 = scmp.ne.s32.totalorder %s19_s19, %s456_s27  ;;  %p462_p5 = scmp.lt.s32.totalorder %s456_s27, %s456_s27 }
   0xa   :  { %p463_p6 = por %p462_p5, %p461_p4 }
   0xc   :  { %p464_p7 = pnand %p463_p6, %p457_p3 }
   0xe   :  { %467 = shalt.err (!%p464_p7)
}
   0xf   :  { %s471_s28 = smov 64   ;;  %s472_s29 = smov 4  }
  0x10   :  { %24 = dma.hbm_to_vmem [thread:$0]  %s575_s1, 2048, %s19_s19, [#allocation3], %s471_s28, %s471_s28, %s472_s29  }
  0x11   :  { %468 = dma.done.wait [#allocation3], 2048  }
  0x12   :  { %469 = vsyncadd [#allocation3], 4294965248  ;;  %v473_v0 = vmov 0.0   ;;  %v422_v1 = vld [vmem:[#allocation2 + $0x40] sm:$0xff]   ;;  %v424_v3 = vld [vmem:[#allocation2 + $0x48] sm:$0xff]   ;;  %vm474_vm0 = vmmov 0  }
  0x13   :  { %397 = vmatprep.subr.bf16.mxu1 %v473_v0  ;;  %v423_v2 = vld [vmem:[#allocation2] sm:$0xff]   ;;  %366 = vmatprep.subr.bf16.mxu0 %v422_v1  ;;  %v425_v4 = vld [vmem:[#allocation2 + $0x8] sm:$0xff]   ;;  %v426_v5 = vld [vmem:[#allocation2 + $0x50] sm:$0xff]   ;;  %vm332_vm1 = vcmask 31744  }
  0x14   :  { %367 = vmatpush3.bf16.msra.mxu0 %v423_v2  ;;  %v427_v6 = vld [vmem:[#allocation2 + $0x10] sm:$0xff]   ;;  %v428_v7 = vld [vmem:[#allocation2 + $0x58] sm:$0xff]   ;;  %v430_v9 = vld [vmem:[#allocation2 + $0x60] sm:$0xff]   ;;  %413 = vmatprep.mubr.msk.bf16.mxu1 %vm474_vm0, %v473_v0 }
  0x15   :  { %368 = vmatprep.subr.bf16.mxu0 %v424_v3  ;;  %v429_v8 = vld [vmem:[#allocation2 + $0x18] sm:$0xff]   ;;  %v431_v10 = vld [vmem:[#allocation2 + $0x20] sm:$0xff]   ;;  %v432_v11 = vld [vmem:[#allocation2 + $0x68] sm:$0xff]  }
  0x16   :  { %v36_v12 = vld [vmem:[%s574_s0 + $0x8] sm:$0xff]  ;;  %v38_v13 = vld [vmem:[%s574_s0 + $0x18] sm:$0xff]  ;;  %v438_v16 = vld [vmem:[%s577_s3] sm:$0xff]  }
  0x17   :  { %v433_v14 = vld [vmem:[#allocation2 + $0x28] sm:$0xff]   ;;  %v40_v15 = vpack.c.bf16 %v38_v13, %v36_v12  ;;  %v434_v17 = vld [vmem:[#allocation2 + $0x70] sm:$0xff]   ;;  %398 = vmatpush3.bf16.msra.mxu1 %v438_v16  ;;  %v436_v20 = vld [vmem:[#allocation2 + $0x78] sm:$0xff]  }
  0x18   :  { %369 = vmatpush3.bf16.msra.mxu0 %v425_v4  ;;  %v439_v18 = vld [vmem:[%s577_s3 + $0x8] sm:$0xff]   ;;  %399 = vmatprep.subr.bf16.mxu1 %v473_v0  ;;  %v435_v19 = vld [vmem:[#allocation2 + $0x30] sm:$0xff]   ;;  %v437_v22 = vld [vmem:[#allocation2 + $0x38] sm:$0xff]  }
  0x19   :  { %370 = vmatprep.subr.bf16.mxu0 %v426_v5  ;;  %208 = vmatprep.mubr.bf16.mxu0 %v40_v15  ;;  %v440_v21 = vld [vmem:[%s577_s3 + $0x10] sm:$0xff]   ;;  %v35_v23 = vld [vmem:[%s574_s0] sm:$0xff]  ;;  %v441_v25 = vld [vmem:[%s577_s3 + $0x18] sm:$0xff]  }
  0x1a   :  { %v37_v24 = vld [vmem:[%s574_s0 + $0x10] sm:$0xff]  ;;  %v442_v27 = vld [vmem:[%s577_s3 + $0x20] sm:$0xff]   ;;  %v443_v28 = vld [vmem:[%s577_s3 + $0x28] sm:$0xff]  }
  0x1b   :  { %400 = vmatpush3.bf16.msra.mxu1 %v439_v18  ;;  %v39_v26 = vpack.c.bf16 %v37_v24, %v35_v23  ;;  %v444_v29 = vld [vmem:[%s577_s3 + $0x30] sm:$0xff]   ;;  %v445_v30 = vld [vmem:[%s577_s3 + $0x38] sm:$0xff]   ;;  %v340_v32 = vld [vmem:[%s576_s2] ss:$0 sm:$0xff] }
  0x1c   :  { %371 = vmatpush3.bf16.msra.mxu0 %v427_v6  ;;  %401 = vmatprep.subr.bf16.mxu1 %v473_v0  ;;  %v357_v43 = vld [vmem:[%s578_s4] ss:$0 sm:$0xff] }
  0x1d   :  { %372 = vmatprep.subr.bf16.mxu0 %v428_v7 }
  0x1f   :  { %402 = vmatpush3.bf16.msra.mxu1 %v440_v21 }
  0x20   :  { %373 = vmatpush3.bf16.msra.mxu0 %v429_v8  ;;  %403 = vmatprep.subr.bf16.mxu1 %v473_v0 }
  0x21   :  { %374 = vmatprep.subr.bf16.mxu0 %v430_v9 }
  0x23   :  { %404 = vmatpush3.bf16.msra.mxu1 %v441_v25 }
  0x24   :  { %375 = vmatpush3.bf16.msra.mxu0 %v431_v10  ;;  %405 = vmatprep.subr.bf16.mxu1 %v473_v0 }
  0x25   :  { %376 = vmatprep.subr.bf16.mxu0 %v432_v11 }
  0x27   :  { %406 = vmatpush3.bf16.msra.mxu1 %v442_v27 }
  0x28   :  { %377 = vmatpush3.bf16.msra.mxu0 %v433_v14  ;;  %407 = vmatprep.subr.bf16.mxu1 %v473_v0 }
  0x29   :  { %378 = vmatprep.subr.bf16.mxu0 %v434_v17 }
  0x2b   :  { %408 = vmatpush3.bf16.msra.mxu1 %v443_v28 }
  0x2c   :  { %379 = vmatpush3.bf16.msra.mxu0 %v435_v19  ;;  %409 = vmatprep.subr.bf16.mxu1 %v473_v0 }
  0x2d   :  { %380 = vmatprep.subr.bf16.mxu0 %v436_v20 }
  0x2f   :  { %410 = vmatpush3.bf16.msra.mxu1 %v444_v29 }
  0x30   :  { %381 = vmatpush3.bf16.msra.mxu0 %v437_v22  ;;  %411 = vmatprep.subr.bf16.mxu1 %v473_v0 }
  0x33   :  { %209 = vmatmul.mubr.bf16.vlgmr.msra.gmra.mrb[0].mxu0 %v39_v26  ;;  %412 = vmatpush3.bf16.msra.mxu1 %v445_v30 }
 0x106   :  { %v382_v31 = vpop.f32.mrb[0].mxu0 }
 0x107   :  { %v383_v33 = vpop.f32.mrb[1].mxu0 }
 0x108   :  { %v384_v34 = vadd.f32 %v383_v33, %v382_v31  ;;  %v385_v35 = vpop.f32.mrb[2].mxu0 }
 0x109   :  { %v386_v36 = vpop.f32.mrb[3].mxu0 }
 0x10a   :  { %v211_v37 = vadd.f32 %v384_v34, %v340_v32  ;;  %v387_v38 = vadd.f32 %v386_v36, %v385_v35 }
 0x10c   :  { %v214_v39 = vadd.f32 %v387_v38, %v340_v32  ;;  %v217_v40 = vmax.f32 %v211_v37, 0.0 }
 0x10e   :  { %v218_v41 = vmax.f32 %v214_v39, 0.0 }
 0x110   :  { %v219_v42 = vpack.c.bf16 %v218_v41, %v217_v40 }
 0x112   :  { %414 = vmatmul.mubr.bf16.vlgmr.msra.gmra.mrb[0].mxu1 %v219_v42 }
 0x1e5   :  { %v325_v44 = vpop.f32.mrb[0].mxu1 }
 0x1e6   :  { %v326_v45 = vadd.f32 %v357_v43, %v325_v44  ;;  %v415_v46 = vpop.f32.mrb[1].mxu1 }
 0x1e7   :  { %v328_v47 = vpop.f32.mrb[2].mxu1 }
 0x1e8   :  { %333 = vst.msk [vmem:[%s579_s5] sm:$0xff] %vm332_vm1, %v326_v45  ;;  %v329_v48 = vadd.f32 %v357_v43, %v328_v47  ;;  %v416_v49 = vpop.f32.mrb[3].mxu1 }
 0x1ea   :  { %334 = vst.msk [vmem:[%s579_s5 + $0x8] sm:$0xff] %vm332_vm1, %v329_v48 }
 0x1eb   :  { %339 = vsyncpa [#allocation3], 1 }

</bundles_post_ra>
